<compile_context>
chip_gen: v7x
topology: tpu7x:2x2x1
jax: 0.10.0
libtpu: 0.0.40
codegen_flags: <defaults>
</compile_context>

<pallas_src>
import jax
import jax.numpy as jnp
from jax.experimental import pallas as pl
from jax.experimental.pallas import tpu as pltpu


def _round_up(n, m):
    return ((n + m - 1) // m) * m


def _choose_batch_tiling(B):
    """Pick (tile_b, b_pad).

    - Pad the batch only to a multiple of 8 (sublane alignment) instead of to a
      multiple of the tile, so we never DMA/compute ~a whole extra tile of junk rows.
    - Tiles up to 2048 rows amortize the per-grid-step overhead (>=86% of HBM roofline).
    - For B large enough to matter, keep >= 2 grid steps so the 'parallel' batch axis
      can shard across both TensorCores on v7x (v5e/v6e are single-TC; harmless there).
    """
    MAX_TILE = 2048
    b8 = _round_up(max(B, 1), 8)
    if b8 <= 512:
        return b8, b8  # tiny batch: one tile; splitting is pure per-step overhead
    n_tiles = max(2, -(-b8 // MAX_TILE))
    tile_b = _round_up(-(-b8 // n_tiles), 8)
    return tile_b, tile_b * n_tiles


def actor_mlp_kernel(x_ref, w1_ref, b1_ref, w2_ref, b2_ref, w3_ref, b3_ref, o_ref):
    # One (tile_b, in_p) bf16 batch tile; all three layers fused in VMEM.
    x = x_ref[...]  # already bf16 (cast fused into the wrapper's pad)

    h1 = jnp.dot(x, w1_ref[...], preferred_element_type=jnp.float32) + b1_ref[...]
    h1 = jnp.maximum(h1, 0.0)

    h2 = jnp.dot(h1.astype(jnp.bfloat16), w2_ref[...],
                 preferred_element_type=jnp.float32) + b2_ref[...]
    h2 = jnp.maximum(h2, 0.0)

    logits = jnp.dot(h2.astype(jnp.bfloat16), w3_ref[...],
                     preferred_element_type=jnp.float32) + b3_ref[...]
    o_ref[...] = logits.astype(o_ref.dtype)
    # TODO(synk): the module's forward() returns raw logits, so we keep that contract;
    # if the caller only needs actions/log-probs, fuse log-softmax + categorical sampling
    # here (mask padded lanes >= out_dim to -inf first) — EUP/XLU slots are idle and it
    # removes the dominant 128-lane f32 logits HBM write.


def init_actor_params(key, in_dim, out_dim, hidden_dim=64):
    """PyTorch nn.Linear-style init (uniform +-1/sqrt(fan_in)).

    Feature padding: in_dim only to a multiple of 16 (bf16 sublane packing, no HBM waste);
    hidden/out to 128 (lane-dense matmuls / unmasked output stores).  Zero padding is
    mathematically inert.  Weights stored bf16 for the MXU; biases stay f32.
    """
    ks = jax.random.split(key, 6)

    def linear(kw, kb, fan_in, fan_out):
        bound = 1.0 / (fan_in ** 0.5)
        w = jax.random.uniform(kw, (fan_in, fan_out), jnp.float32, -bound, bound)
        b = jax.random.uniform(kb, (1, fan_out), jnp.float32, -bound, bound)
        return w, b

    w1, b1 = linear(ks[0], ks[1], in_dim, hidden_dim)
    w2, b2 = linear(ks[2], ks[3], hidden_dim, hidden_dim)
    w3, b3 = linear(ks[4], ks[5], hidden_dim, out_dim)

    in_p = _round_up(in_dim, 16)        # NOT 128: cuts x HBM read traffic for small in_dim
    hid_p = _round_up(hidden_dim, 128)
    out_p = _round_up(out_dim, 128)

    def pad2(a, rows, cols):
        return jnp.pad(a, ((0, rows - a.shape[0]), (0, cols - a.shape[1])))

    return {
        "w1": pad2(w1, in_p, hid_p).astype(jnp.bfloat16),
        "b1": pad2(b1, 1, hid_p),
        "w2": pad2(w2, hid_p, hid_p).astype(jnp.bfloat16),
        "b2": pad2(b2, 1, hid_p),
        "w3": pad2(w3, hid_p, out_p).astype(jnp.bfloat16),
        "b3": pad2(b3, 1, out_p),
        "in_dim": in_dim,
        "out_dim": out_dim,
        "hidden_dim": hidden_dim,
    }


def actor_forward(x, params):
    """x: (B, in_dim) float32 -> logits (B, out_dim) float32."""
    w1, b1 = params["w1"], params["b1"]
    w2, b2 = params["w2"], params["b2"]
    w3, b3 = params["w3"], params["b3"]
    out_dim = params["out_dim"]

    in_p, hid_p = w1.shape
    out_p = w3.shape[1]
    B, in_dim = x.shape

    tile_b, b_pad = _choose_batch_tiling(B)

    # bf16 cast fuses with the pad: half the x DMA bytes, no extra HBM pass.
    x_p = jnp.pad(x.astype(jnp.bfloat16), ((0, b_pad - B), (0, in_p - in_dim)))

    flops = 2 * b_pad * (in_p * hid_p + hid_p * hid_p + hid_p * out_p)
    bytes_accessed = (
        x_p.size * 2
        + (w1.size + w2.size + w3.size) * 2
        + (b1.size + b2.size + b3.size) * 4
        + b_pad * out_p * 4
    )

    def const_spec(a):
        # Constant index_map: weights/biases stay VMEM-resident across the batch grid.
        return pl.BlockSpec(a.shape, lambda i: (0,) * a.ndim)

    logits_padded = pl.pallas_call(
        actor_mlp_kernel,
        out_shape=jax.ShapeDtypeStruct((b_pad, out_p), jnp.float32),
        grid=(b_pad // tile_b,),
        in_specs=[
            pl.BlockSpec((tile_b, in_p), lambda i: (i, 0)),   # x: tiled over batch
            const_spec(w1), const_spec(b1),
            const_spec(w2), const_spec(b2),
            const_spec(w3), const_spec(b3),
        ],
        out_specs=pl.BlockSpec((tile_b, out_p), lambda i: (i, 0)),
        compiler_params=pltpu.CompilerParams(
            dimension_semantics=("parallel",),
        ),
        cost_estimate=pl.CostEstimate(
            flops=flops, transcendentals=0, bytes_accessed=bytes_accessed
        ),
    )(x_p, w1, b1, w2, b2, w3, b3)

    # Drop batch padding and zero-bias padded logit columns (must never reach softmax).
    return logits_padded[:B, :out_dim]


if __name__ == "__main__":
    key = jax.random.PRNGKey(0)
    k_params, k_x = jax.random.split(key)

    batch, in_dim, hidden_dim, out_dim = 8, 32, 64, 6
    params = init_actor_params(k_params, in_dim, out_dim, hidden_dim)
    x = jax.random.normal(k_x, (batch, in_dim), jnp.float32)

    logits = actor_forward(x, params)
    jax.block_until_ready(logits)

    # Reference in plain JAX using the exact same bf16-quantized weights / casts.
    xb = x.astype(jnp.bfloat16)
    h1 = jnp.maximum(
        jnp.dot(xb, params["w1"][:in_dim], preferred_element_type=jnp.float32)
        + params["b1"], 0.0)
    h2 = jnp.maximum(
        jnp.dot(h1.astype(jnp.bfloat16), params["w2"],
                preferred_element_type=jnp.float32) + params["b2"], 0.0)
    ref = (jnp.dot(h2.astype(jnp.bfloat16), params["w3"],
                   preferred_element_type=jnp.float32) + params["b3"])[:, :out_dim]

    assert logits.shape == (batch, out_dim)
    assert jnp.allclose(logits, ref, atol=1e-2, rtol=1e-2), (
        float(jnp.max(jnp.abs(logits - ref)))
    )

    print("KERNEL_OK")
</pallas_src>

<mosaic_0001>
module attributes {stable_mosaic.version = 11 : i64} {
  func.func @actor_mlp_kernel(%arg0: i32, %arg1: memref<8x32xbf16, #tpu.memory_space<vmem>>, %arg2: memref<32x128xbf16, #tpu.memory_space<vmem>>, %arg3: memref<1x128xf32, #tpu.memory_space<vmem>>, %arg4: memref<128x128xbf16, #tpu.memory_space<vmem>>, %arg5: memref<1x128xf32, #tpu.memory_space<vmem>>, %arg6: memref<128x128xbf16, #tpu.memory_space<vmem>>, %arg7: memref<1x128xf32, #tpu.memory_space<vmem>>, %arg8: memref<8x128xf32, #tpu.memory_space<vmem>>) attributes {dimension_semantics = [#tpu.dimension_semantics<parallel>], iteration_bounds = array<i64: 1>, scalar_prefetch = 0 : i64, scratch_operands = 0 : i64, tpu.core_type = #tpu.core_type<tc>, window_params = [{transform_indices = @transform_0, window_bounds = array<i64: 8, 32>}, {pipeline_mode = #tpu.pipeline_mode<synchronous>, transform_indices = @transform_1, window_bounds = array<i64: 32, 128>}, {pipeline_mode = #tpu.pipeline_mode<synchronous>, transform_indices = @transform_2, window_bounds = array<i64: 1, 128>}, {pipeline_mode = #tpu.pipeline_mode<synchronous>, transform_indices = @transform_3, window_bounds = array<i64: 128, 128>}, {pipeline_mode = #tpu.pipeline_mode<synchronous>, transform_indices = @transform_4, window_bounds = array<i64: 1, 128>}, {pipeline_mode = #tpu.pipeline_mode<synchronous>, transform_indices = @transform_5, window_bounds = array<i64: 128, 128>}, {pipeline_mode = #tpu.pipeline_mode<synchronous>, transform_indices = @transform_6, window_bounds = array<i64: 1, 128>}, {transform_indices = @transform_7, window_bounds = array<i64: 8, 128>}]} {
    %c0 = arith.constant 0 : index
    %c0_0 = arith.constant 0 : index
    %0 = vector.load %arg1[%c0, %c0_0] : memref<8x32xbf16, #tpu.memory_space<vmem>>, vector<8x32xbf16>
    %c0_1 = arith.constant 0 : index
    %c0_2 = arith.constant 0 : index
    %1 = vector.load %arg2[%c0_1, %c0_2] : memref<32x128xbf16, #tpu.memory_space<vmem>>, vector<32x128xbf16>
    %cst = arith.constant dense<0.000000e+00> : vector<8x128xf32>
    %2 = tpu.matmul %0, %1, %cst {dimension_numbers = #tpu.dot_dimension_numbers<[1], [0], [0], [1], [0, 0, 1, 1], [], []>} : vector<8x32xbf16>, vector<32x128xbf16>, vector<8x128xf32> -> vector<8x128xf32>
    %c0_3 = arith.constant 0 : index
    %c0_4 = arith.constant 0 : index
    %3 = vector.load %arg3[%c0_3, %c0_4] : memref<1x128xf32, #tpu.memory_space<vmem>>, vector<1x128xf32>
    %4 = vector.broadcast %3 : vector<1x128xf32> to vector<8x128xf32>
    %5 = arith.addf %2, %4 : vector<8x128xf32>
    %cst_5 = arith.constant 0.000000e+00 : f32
    %6 = vector.broadcast %cst_5 : f32 to vector<8x128xf32>
    %7 = arith.maximumf %5, %6 : vector<8x128xf32>
    %8 = arith.truncf %7 : vector<8x128xf32> to vector<8x128xbf16>
    %c0_6 = arith.constant 0 : index
    %c0_7 = arith.constant 0 : index
    %9 = vector.load %arg4[%c0_6, %c0_7] : memref<128x128xbf16, #tpu.memory_space<vmem>>, vector<128x128xbf16>
    %cst_8 = arith.constant dense<0.000000e+00> : vector<8x128xf32>
    %10 = tpu.matmul %8, %9, %cst_8 {dimension_numbers = #tpu.dot_dimension_numbers<[1], [0], [0], [1], [0, 0, 1, 1], [], []>} : vector<8x128xbf16>, vector<128x128xbf16>, vector<8x128xf32> -> vector<8x128xf32>
    %c0_9 = arith.constant 0 : index
    %c0_10 = arith.constant 0 : index
    %11 = vector.load %arg5[%c0_9, %c0_10] : memref<1x128xf32, #tpu.memory_space<vmem>>, vector<1x128xf32>
    %12 = vector.broadcast %11 : vector<1x128xf32> to vector<8x128xf32>
    %13 = arith.addf %10, %12 : vector<8x128xf32>
    %cst_11 = arith.constant 0.000000e+00 : f32
    %14 = vector.broadcast %cst_11 : f32 to vector<8x128xf32>
    %15 = arith.maximumf %13, %14 : vector<8x128xf32>
    %16 = arith.truncf %15 : vector<8x128xf32> to vector<8x128xbf16>
    %c0_12 = arith.constant 0 : index
    %c0_13 = arith.constant 0 : index
    %17 = vector.load %arg6[%c0_12, %c0_13] : memref<128x128xbf16, #tpu.memory_space<vmem>>, vector<128x128xbf16>
    %cst_14 = arith.constant dense<0.000000e+00> : vector<8x128xf32>
    %18 = tpu.matmul %16, %17, %cst_14 {dimension_numbers = #tpu.dot_dimension_numbers<[1], [0], [0], [1], [0, 0, 1, 1], [], []>} : vector<8x128xbf16>, vector<128x128xbf16>, vector<8x128xf32> -> vector<8x128xf32>
    %c0_15 = arith.constant 0 : index
    %c0_16 = arith.constant 0 : index
    %19 = vector.load %arg7[%c0_15, %c0_16] : memref<1x128xf32, #tpu.memory_space<vmem>>, vector<1x128xf32>
    %20 = vector.broadcast %19 : vector<1x128xf32> to vector<8x128xf32>
    %21 = arith.addf %18, %20 : vector<8x128xf32>
    %c0_17 = arith.constant 0 : index
    %c0_18 = arith.constant 0 : index
    %22 = vector.load %arg8[%c0_17, %c0_18] : memref<8x128xf32, #tpu.memory_space<vmem>>, vector<8x128xf32>
    tpu.vector_store %arg8[%c0_17, %c0_18], %21 {strides = array<i32>} : memref<8x128xf32, #tpu.memory_space<vmem>>, vector<8x128xf32>,
    return
  }
  func.func @transform_0(%arg0: i32) -> (i32, i32) {
    %c0_i32 = arith.constant 0 : i32
    %c0_i32_0 = arith.constant 0 : i32
    return %arg0, %c0_i32 : i32, i32
  }
  func.func @transform_1(%arg0: i32) -> (i32, i32) {
    %c0_i32 = arith.constant 0 : i32
    %c0_i32_0 = arith.constant 0 : i32
    %c0_i32_1 = arith.constant 0 : i32
    return %c0_i32, %c0_i32_0 : i32, i32
  }
  func.func @transform_2(%arg0: i32) -> (i32, i32) {
    %c0_i32 = arith.constant 0 : i32
    %c0_i32_0 = arith.constant 0 : i32
    %c0_i32_1 = arith.constant 0 : i32
    return %c0_i32, %c0_i32_0 : i32, i32
  }
  func.func @transform_3(%arg0: i32) -> (i32, i32) {
    %c0_i32 = arith.constant 0 : i32
    %c0_i32_0 = arith.constant 0 : i32
    %c0_i32_1 = arith.constant 0 : i32
    return %c0_i32, %c0_i32_0 : i32, i32
  }
  func.func @transform_4(%arg0: i32) -> (i32, i32) {
    %c0_i32 = arith.constant 0 : i32
    %c0_i32_0 = arith.constant 0 : i32
    %c0_i32_1 = arith.constant 0 : i32
    return %c0_i32, %c0_i32_0 : i32, i32
  }
  func.func @transform_5(%arg0: i32) -> (i32, i32) {
    %c0_i32 = arith.constant 0 : i32
    %c0_i32_0 = arith.constant 0 : i32
    %c0_i32_1 = arith.constant 0 : i32
    return %c0_i32, %c0_i32_0 : i32, i32
  }
  func.func @transform_6(%arg0: i32) -> (i32, i32) {
    %c0_i32 = arith.constant 0 : i32
    %c0_i32_0 = arith.constant 0 : i32
    %c0_i32_1 = arith.constant 0 : i32
    return %c0_i32, %c0_i32_0 : i32, i32
  }
  func.func @transform_7(%arg0: i32) -> (i32, i32) {
    %c0_i32 = arith.constant 0 : i32
    %c0_i32_0 = arith.constant 0 : i32
    return %arg0, %c0_i32 : i32, i32
  }
}

</mosaic_0001>

<bundles_post_ra>
// kernel: tpu_custom_call.1
= control target key start
LH: loop header
LB: loop body
LE: loop exit
PB: predicated region body
PF: predicated region fallthrough
CT: control target
= control target key end

     0   :  { %12 = vsyncpa [#allocation3], 0  ;;  %s780_s0 = inlined_call_operand.hbm [shape: bf16[8,32], index: 0, kind: input, shape index: {}]   ;;  %s781_s1 = inlined_call_operand.hbm [shape: bf16[32,128], index: 1, kind: input, shape index: {}]   ;;  %s782_s2 = inlined_call_operand.vmem [shape: f32[1,128], index: 2, kind: input, shape index: {}]   ;;  %s783_s3 = inlined_call_operand.hbm [shape: bf16[128,128], index: 3, kind: input, shape index: {}]   ;;  %s784_s4 = inlined_call_operand.vmem [shape: f32[1,128], index: 4, kind: input, shape index: {}]   ;;  %s785_s5 = inlined_call_operand.hbm [shape: bf16[128,128], index: 5, kind: input, shape index: {}]   ;;  %s786_s6 = inlined_call_operand.vmem [shape: f32[1,128], index: 6, kind: input, shape index: {}]   ;;  %s787_s7 = inlined_call_operand.hbm [shape: f32[8,128], index: 7, kind: output, shape index: {}]  }
   0x1   :  { %13 = vsyncpa [#allocation6], 0 }
   0x2   :  { %14 = vsyncpa [#allocation9], 0 }
   0x3   :  { %15 = vsyncpa [#allocation4], 0  ;;  %s629_s24 = smov [#allocation5]   ;;  %s511_s28 = scalar_lea.hbm %s781_s1, 256 }
   0x4   :  { %s31_s25 = sshll.u32 %s629_s24, 4  ;;  %p512_p0 = scmp.ne.s32.totalorder %s781_s1, %s511_s28  ;;  %s32_s25 = int_to_ptr.vmem [resolvable:$true] %s31_s25 }
   0x5   :  { %p515_p1 = scmp.lt.u32.totalorder %s511_s28, %s781_s1 }
   0x7   :  { %p517_p2 = pnand %p515_p1, %p512_p0 }
   0x9   :  { %520 = shalt.err (!%p517_p2)
}
   0xa   :  { %s521_s10 = scalar_lea.vmem %s32_s25, 256  ;;  %p526_p4 = scmp.lt.s32.totalorder %s32_s25, %s32_s25 }
   0xb   :  { %p522_p3 = scmp.ne.s32.totalorder %s32_s25, %s521_s10  ;;  %p527_p5 = scmp.lt.s32.totalorder %s521_s10, %s521_s10 }
   0xd   :  { %p528_p6 = por %p527_p5, %p526_p4 }
   0xf   :  { %p529_p7 = pnand %p528_p6, %p522_p3 }
  0x11   :  { %532 = shalt.err (!%p529_p7)
}
  0x12   :  { %s630_s11 = smov 64   ;;  %s631_s12 = smov 4  }
  0x13   :  { %37 = dma.hbm_to_vmem [thread:$0]  %s781_s1, 256, %s32_s25, [#allocation6], %s630_s11, %s630_s11, %s631_s12  }
  0x14   :  { %s632_s15 = smov [#allocation2]   ;;  %s633_s17 = smov [#allocation7]  }
  0x15   :  { %s22_s16 = sshll.u32 %s632_s15, 4  ;;  %s45_s18 = sshll.u32 %s633_s17, 4  ;;  %s23_s16 = int_to_ptr.vmem [resolvable:$true] %s22_s16  ;;  %s46_s18 = int_to_ptr.vmem [resolvable:$true] %s45_s18 }
  0x16   :  { %s533_s21 = scalar_lea.hbm %s780_s0, 64 }
  0x17   :  { %p534_p8 = scmp.ne.s32.totalorder %s780_s0, %s533_s21  ;;  %p537_p9 = scmp.lt.u32.totalorder %s533_s21, %s780_s0 }
  0x19   :  { %p539_p10 = pnand %p537_p9, %p534_p8 }
  0x1b   :  { %542 = shalt.err (!%p539_p10)
}
  0x1c   :  { %s543_s1 = scalar_lea.vmem %s23_s16, 64  ;;  %p548_p12 = scmp.lt.s32.totalorder %s23_s16, %s23_s16 }
  0x1d   :  { %p544_p11 = scmp.ne.s32.totalorder %s23_s16, %s543_s1  ;;  %p549_p13 = scmp.lt.s32.totalorder %s543_s1, %s543_s1 }
  0x1f   :  { %p550_p0 = por %p549_p13, %p548_p12 }
  0x21   :  { %p551_p1 = pnand %p550_p0, %p544_p11 }
  0x23   :  { %554 = shalt.err (!%p551_p1)
}
  0x24   :  { %25 = dma.hbm_to_vmem [thread:$0]  %s780_s0, 64, %s23_s16, [#allocation3]  }
  0x25   :  { %s555_s30 = scalar_lea.hbm %s783_s3, 1024 }
  0x26   :  { %p556_p2 = scmp.ne.s32.totalorder %s783_s3, %s555_s30  ;;  %p559_p3 = scmp.lt.u32.totalorder %s555_s30, %s783_s3 }
  0x28   :  { %p561_p4 = pnand %p559_p3, %p556_p2 }
  0x2a   :  { %564 = shalt.err (!%p561_p4)
}
  0x2b   :  { %s565_s14 = scalar_lea.vmem %s46_s18, 1024  ;;  %p570_p6 = scmp.lt.s32.totalorder %s46_s18, %s46_s18 }
  0x2c   :  { %p566_p5 = scmp.ne.s32.totalorder %s46_s18, %s565_s14  ;;  %p571_p7 = scmp.lt.s32.totalorder %s565_s14, %s565_s14 }
  0x2e   :  { %p572_p8 = por %p571_p7, %p570_p6 }
  0x30   :  { %p573_p9 = pnand %p572_p8, %p566_p5 }
  0x32   :  { %576 = shalt.err (!%p573_p9)
}
  0x33   :  { %51 = dma.hbm_to_vmem [thread:$0]  %s783_s3, 1024, %s46_s18, [#allocation6], %s630_s11, %s630_s11, %s631_s12  }
  0x34   :  { %s634_s16 = smov [#allocation8]   ;;  %s577_s21 = scalar_lea.hbm %s785_s5, 1024 }
  0x35   :  { %s59_s17 = sshll.u32 %s634_s16, 4  ;;  %p578_p10 = scmp.ne.s32.totalorder %s785_s5, %s577_s21  ;;  %s60_s17 = int_to_ptr.vmem [resolvable:$true] %s59_s17 }
  0x36   :  { %p581_p11 = scmp.lt.u32.totalorder %s577_s21, %s785_s5 }
  0x38   :  { %p583_p12 = pnand %p581_p11, %p578_p10 }
  0x3a   :  { %586 = shalt.err (!%p583_p12)
}
  0x3b   :  { %s587_s1 = scalar_lea.vmem %s60_s17, 1024  ;;  %p592_p0 = scmp.lt.s32.totalorder %s60_s17, %s60_s17 }
  0x3c   :  { %p588_p13 = scmp.ne.s32.totalorder %s60_s17, %s587_s1  ;;  %p593_p1 = scmp.lt.s32.totalorder %s587_s1, %s587_s1 }
  0x3e   :  { %p594_p2 = por %p593_p1, %p592_p0 }
  0x40   :  { %p595_p3 = pnand %p594_p2, %p588_p13 }
  0x42   :  { %598 = shalt.err (!%p595_p3)
}
  0x43   :  { %65 = dma.hbm_to_vmem [thread:$0]  %s785_s5, 1024, %s60_s17, [#allocation9], %s630_s11, %s630_s11, %s631_s12  }
  0x44   :  { %621 = dma.done.wait [#allocation3], 64  }
  0x45   :  { %622 = vsyncadd [#allocation3], 4294967232 }
  0x46   :  { %623 = dma.done.wait [#allocation6], 1280  }
  0x47   :  { %624 = vsyncadd [#allocation6], 4294966016 }
  0x48   :  { %625 = dma.done.wait [#allocation9], 1024  }
  0x49   :  { %626 = vsyncadd [#allocation9], 4294966272  ;;  %v635_v0 = vmov 0.0   ;;  %vm636_vm0 = vmmov 0   ;;  %v493_v1 = vld [vmem:[#allocation5] sm:$0xff]   ;;  %v494_v2 = vld [vmem:[#allocation5 + $0x8] sm:$0xff]  }
  0x4a   :  { %436 = vmatprep.subr.bf16.mxu0 %v635_v0  ;;  %440 = vmatprep.mubr.msk.bf16.mxu0 %vm636_vm0, %v635_v0  ;;  %v495_v3 = vld [vmem:[#allocation7] sm:$0xff]   ;;  %vm105_vm1 = vcmask 261120   ;;  %v496_v4 = vld [vmem:[#allocation7 + $0x8] sm:$0xff]   ;;  %v497_v6 = vld [vmem:[#allocation7 + $0x10] sm:$0xff]   ;;  %s637_s28 = smov [#allocation10]  }
  0x4b   :  { %444 = vmatprep.subr.bf16.mxu1 %v635_v0  ;;  %460 = vmatprep.mubr.msk.bf16.mxu1 %vm636_vm0, %v635_v0  ;;  %v81_v5 = vld [vmem:[#allocation2] sm:$0xf]  ;;  %v498_v7 = vld [vmem:[#allocation7 + $0x18] sm:$0xff]   ;;  %v499_v8 = vld [vmem:[#allocation7 + $0x20] sm:$0xff]   ;;  %s382_s29 = sshll.u32 %s637_s28, 4  ;;  %s383_s29 = int_to_ptr.vmem [resolvable:$true] %s382_s29 }
  0x4c   :  { %437 = vmatpush3.bf16.msra.mxu0 %v493_v1  ;;  %445 = vmatpush3.bf16.msra.mxu1 %v495_v3  ;;  %v500_v9 = vld [vmem:[#allocation7 + $0x28] sm:$0xff]   ;;  %v501_v10 = vld [vmem:[#allocation7 + $0x30] sm:$0xff]   ;;  %v502_v11 = vld [vmem:[#allocation7 + $0x38] sm:$0xff]   ;;  %p604_p5 = scmp.lt.s32.totalorder %s383_s29, %s383_s29 }
  0x4d   :  { %438 = vmatprep.subr.bf16.mxu0 %v635_v0  ;;  %446 = vmatprep.subr.bf16.mxu1 %v635_v0  ;;  %v503_v12 = vld [vmem:[#allocation8] sm:$0xff]   ;;  %v504_v13 = vld [vmem:[#allocation8 + $0x8] sm:$0xff]   ;;  %v505_v14 = vld [vmem:[#allocation8 + $0x10] sm:$0xff]  }
  0x4e   :  { %v506_v15 = vld [vmem:[#allocation8 + $0x18] sm:$0xff]   ;;  %v507_v16 = vld [vmem:[#allocation8 + $0x20] sm:$0xff]   ;;  %v508_v17 = vld [vmem:[#allocation8 + $0x28] sm:$0xff]  }
  0x4f   :  { %v393_v18 = vld [vmem:[%s782_s2] ss:$0 sm:$0xff]  ;;  %v509_v26 = vld [vmem:[#allocation8 + $0x30] sm:$0xff]   ;;  %v510_v27 = vld [vmem:[#allocation8 + $0x38] sm:$0xff]  }
  0x50   :  { %439 = vmatpush3.bf16.msra.mxu0 %v494_v2  ;;  %447 = vmatpush3.bf16.msra.mxu1 %v496_v4  ;;  %v397_v28 = vld [vmem:[%s784_s4] ss:$0 sm:$0xff]  ;;  %s599_s4 = scalar_lea.vmem %s383_s29, 128 }
  0x51   :  { %464 = vmatprep.subr.bf16.mxu0 %v635_v0  ;;  %448 = vmatprep.subr.bf16.mxu1 %v635_v0  ;;  %v406_v36 = vld [vmem:[%s786_s6] ss:$0 sm:$0xff]  ;;  %p600_p4 = scmp.ne.s32.totalorder %s383_s29, %s599_s4  ;;  %p605_p6 = scmp.lt.s32.totalorder %s599_s4, %s599_s4 }
  0x53   :  { %441 = vmatmul.mubr.msk.bf16.vlgmr.msra.gmra.mrb[0].mxu0 %vm105_vm1, %v81_v5  ;;  %p606_p7 = por %p605_p6, %p604_p5 }
  0x54   :  { %480 = vmatprep.mubr.msk.bf16.mxu0 %vm636_vm0, %v635_v0  ;;  %449 = vmatpush3.bf16.msra.mxu1 %v497_v6 }
  0x55   :  { %450 = vmatprep.subr.bf16.mxu1 %v635_v0  ;;  %465 = vmatpush3.bf16.msra.mxu0 %v503_v12  ;;  %p607_p8 = pnand %p606_p7, %p600_p4 }
  0x56   :  { %466 = vmatprep.subr.bf16.mxu0 %v635_v0 }
  0x58   :  { %451 = vmatpush3.bf16.msra.mxu1 %v498_v7 }
  0x59   :  { %452 = vmatprep.subr.bf16.mxu1 %v635_v0  ;;  %467 = vmatpush3.bf16.msra.mxu0 %v504_v13 }
  0x5a   :  { %468 = vmatprep.subr.bf16.mxu0 %v635_v0 }
  0x5c   :  { %453 = vmatpush3.bf16.msra.mxu1 %v499_v8 }
  0x5d   :  { %454 = vmatprep.subr.bf16.mxu1 %v635_v0  ;;  %469 = vmatpush3.bf16.msra.mxu0 %v505_v14 }
  0x5e   :  { %470 = vmatprep.subr.bf16.mxu0 %v635_v0 }
  0x60   :  { %455 = vmatpush3.bf16.msra.mxu1 %v500_v9 }
  0x61   :  { %456 = vmatprep.subr.bf16.mxu1 %v635_v0  ;;  %471 = vmatpush3.bf16.msra.mxu0 %v506_v15 }
  0x62   :  { %472 = vmatprep.subr.bf16.mxu0 %v635_v0 }
  0x64   :  { %457 = vmatpush3.bf16.msra.mxu1 %v501_v10 }
  0x65   :  { %458 = vmatprep.subr.bf16.mxu1 %v635_v0  ;;  %473 = vmatpush3.bf16.msra.mxu0 %v507_v16 }
  0x66   :  { %474 = vmatprep.subr.bf16.mxu0 %v635_v0 }
  0x68   :  { %459 = vmatpush3.bf16.msra.mxu1 %v502_v11 }
  0x69   :  { %475 = vmatpush3.bf16.msra.mxu0 %v508_v17 }
  0x6a   :  { %476 = vmatprep.subr.bf16.mxu0 %v635_v0 }
  0x6d   :  { %477 = vmatpush3.bf16.msra.mxu0 %v509_v26 }
  0x6e   :  { %478 = vmatprep.subr.bf16.mxu0 %v635_v0 }
  0x71   :  { %479 = vmatpush3.bf16.msra.mxu0 %v510_v27 }
 0x126   :  { %v143_v19 = vpop.f32.mrb[0].mxu0 }
 0x127   :  { %v144_v20 = vadd.f32 %v393_v18, %v143_v19  ;;  %v442_v21 = vpop.f32.mrb[1].mxu0 }
 0x128   :  { %v146_v22 = vpop.f32.mrb[2].mxu0 }
 0x129   :  { %v149_v23 = vmax.f32 %v144_v20, 0.0  ;;  %v443_v24 = vpop.f32.mrb[3].mxu0 }
 0x12b   :  { %v150_v25 = vpack.c.bf16 %v149_v23, %v149_v23 }
 0x12d   :  { %461 = vmatmul.mubr.bf16.vlgmr.msra.gmra.mrb[0].mxu1 %v150_v25 }
 0x200   :  { %v256_v29 = vpop.f32.mrb[0].mxu1 }
 0x201   :  { %v257_v30 = vadd.f32 %v397_v28, %v256_v29  ;;  %v462_v31 = vpop.f32.mrb[1].mxu1 }
 0x202   :  { %v259_v32 = vpop.f32.mrb[2].mxu1 }
 0x203   :  { %v262_v33 = vmax.f32 %v257_v30, 0.0  ;;  %v463_v34 = vpop.f32.mrb[3].mxu1 }
 0x205   :  { %v263_v35 = vpack.c.bf16 %v262_v33, %v262_v33 }
 0x207   :  { %481 = vmatmul.mubr.bf16.vlgmr.msra.gmra.mrb[4].mxu0 %v263_v35 }
 0x2da   :  { %v369_v37 = vpop.f32.mrb[4].mxu0 }
 0x2db   :  { %v370_v38 = vadd.f32 %v406_v36, %v369_v37  ;;  %v482_v39 = vpop.f32.mrb[5].mxu0 }
 0x2dc   :  { %v372_v40 = vpop.f32.mrb[6].mxu0 }
 0x2dd   :  { %375 = vst [vmem:[#allocation10] sm:$0xff] %v370_v38  ;;  %v483_v41 = vpop.f32.mrb[7].mxu0 }
 0x2de   :  { %610 = shalt.err (!%p607_p8)
}
 0x2df   :  { %s611_s6 = scalar_lea.hbm %s787_s7, 128 }
 0x2e0   :  { %p612_p9 = scmp.ne.s32.totalorder %s787_s7, %s611_s6  ;;  %p615_p10 = scmp.lt.u32.totalorder %s611_s6, %s787_s7 }
 0x2e2   :  { %p617_p11 = pnand %p615_p10, %p612_p9 }
 0x2e4   :  { %620 = shalt.err (!%p617_p11)
}
 0x2e5   :  { %385 = dma.vmem_to_hbm [thread:$0]  %s383_s29, 128, %s787_s7, [#allocation4]  }
 0x2e6   :  { %627 = dma.done.wait [#allocation4], 128  }
 0x2e7   :  { %628 = vsyncadd [#allocation4], 4294967168 }
 0x2e8   :  { %389 = vsyncpa [#allocation3], 1 }
 0x2e9   :  { %390 = vsyncpa [#allocation6], 1 }
 0x2ea   :  { %391 = vsyncpa [#allocation9], 1 }
 0x2eb   :  { %392 = vsyncpa [#allocation4], 1 }

</bundles_post_ra>
